<compile_context>
chip_gen: v5e
topology: v5e:2x2
jax: 0.10.0
libtpu: 0.0.40
codegen_flags: <defaults>
</compile_context>

<pallas_src>
import functools

import jax
import jax.numpy as jnp
from jax.experimental import pallas as pl
from jax.experimental.pallas import tpu as pltpu


def _round_up(x, m):
    return ((x + m - 1) // m) * m


def _pred_kernel(x_ref, w1t_ref, b1_ref, w2t_ref, b2_ref, sel_ref, shift_ref, o_ref):
    """Per-pixel MLP head on a channel-major (Cin, T) slab.

    Shapes (per grid step):
      x_ref    : (Cin, T)          w1t_ref : (hidden, Cin)    b1_ref : (hidden, 1)
      w2t_ref  : (Cout_p, hidden)  b2_ref  : (Cout_p, 1)
      sel_ref  : (Cout_p, 1)  1.0 where sigmoid is applied (conf + x/y channels)
      shift_ref: (Cout_p, 1)  0.5 on x/y channels (subtracted after sigmoid), else 0
      o_ref    : (Cout_p, T)
    """
    x = x_ref[...]                                                    # (Cin, T) f32

    # First 1x1 conv + bias + LeakyReLU(0.01). Canonical MXU matmul.
    h = jnp.dot(w1t_ref[...], x, preferred_element_type=jnp.float32)  # (hidden, T)
    h = h + b1_ref[...]                                               # lane-broadcast bias
    h = jnp.where(h > 0, h, 0.01 * h)

    # Second 1x1 conv + bias.
    y = jnp.dot(w2t_ref[...], h, preferred_element_type=jnp.float32)  # (Cout_p, T)
    y = y + b2_ref[...]

    # Per-channel activation: sigmoid on conf, sigmoid-0.5 on x/y offsets, identity
    # elsewhere. sigmoid runs on the EUP slot (free-ish); select is one VPU op.
    sig = jax.nn.sigmoid(y) - shift_ref[...]
    o_ref[...] = jnp.where(sel_ref[...] > 0.0, sig, y)


@functools.partial(jax.jit, static_argnames=("num_anchors", "num_classes", "tile_hw"))
def prediction_network_forward(features, w1, b1, w2, b2, *, num_anchors, num_classes,
                               tile_hw=512):
    """Inference-mode forward pass of PredictionNetwork.

    features: (B, in_dim, H, W) float32  (NCHW, as in PyTorch)
    w1: (in_dim, hidden)       b1: (hidden,)
    w2: (hidden, 5*A + C)      b2: (5*A + C,)

    Returns:
      conf_scores : (B, A, H, W)
      offsets     : (B, A, 4, H, W)
      class_scores: (B, C, H, W)
    """
    B, Cin, H, W = features.shape
    A = num_anchors
    C = num_classes
    out_ch = 5 * A + C
    hidden = w1.shape[1]
    HW = H * W

    # ---- Pad output channels to a lane-dense multiple of 128 and pre-transpose the
    #      weights so the kernel runs canonical (M,K)x(K,N) MXU matmuls. Extra
    #      columns are zero weight/bias -> sliced off after the kernel.
    out_pad = _round_up(out_ch, 128)
    w1t = jnp.transpose(w1)                                            # (hidden, Cin)
    w2tp = jnp.pad(jnp.transpose(w2), ((0, out_pad - out_ch), (0, 0)))  # (out_pad, hidden)
    b1p = b1.reshape(hidden, 1)
    b2p = jnp.pad(b2.reshape(-1), (0, out_pad - out_ch)).reshape(out_pad, 1)

    # ---- Precomputed per-output-channel activation masks (sublane-broadcast in-kernel):
    #      c < 5*A and c%5 == 0      -> sigmoid          (conf)
    #      c < 5*A and c%5 in {1,2}  -> sigmoid - 0.5    (x/y offsets)
    #      otherwise                 -> identity         (w/h offsets, class, pad)
    ch = jnp.arange(out_pad)
    d = ch % 5
    is_anchor = ch < 5 * A
    sel = (is_anchor & (d < 3)).astype(jnp.float32).reshape(out_pad, 1)
    shift = (is_anchor & ((d == 1) | (d == 2))).astype(jnp.float32).reshape(out_pad, 1) * 0.5

    # ---- Channel-major view of the features; pad spatial to a multiple of 128 so
    #      the lane axis of every block is dense and 128-aligned.
    x = features.reshape(B, Cin, HW)
    hw_pad = _round_up(HW, 128)
    if hw_pad != HW:
        x = jnp.pad(x, ((0, 0), (0, 0), (0, hw_pad - HW)))

    # Pick a spatial tile (multiple of 128) that divides the padded spatial extent.
    t = min(tile_hw, hw_pad)
    t = max(128, (t // 128) * 128)
    while hw_pad % t != 0:
        t -= 128
    tile = t

    grid = (B, hw_pad // tile)

    out = pl.pallas_call(
        _pred_kernel,
        out_shape=jax.ShapeDtypeStruct((B, out_pad, hw_pad), jnp.float32),
        grid=grid,
        in_specs=[
            pl.BlockSpec((None, Cin, tile), lambda b, j: (b, 0, j)),   # x slab
            pl.BlockSpec((hidden, Cin), lambda b, j: (0, 0)),          # w1^T (resident)
            pl.BlockSpec((hidden, 1), lambda b, j: (0, 0)),            # b1   (resident)
            pl.BlockSpec((out_pad, hidden), lambda b, j: (0, 0)),      # w2^T (resident)
            pl.BlockSpec((out_pad, 1), lambda b, j: (0, 0)),           # b2   (resident)
            pl.BlockSpec((out_pad, 1), lambda b, j: (0, 0)),           # sigmoid mask
            pl.BlockSpec((out_pad, 1), lambda b, j: (0, 0)),           # 0.5 shift
        ],
        out_specs=pl.BlockSpec((None, out_pad, tile), lambda b, j: (b, 0, j)),
        compiler_params=pltpu.CompilerParams(
            dimension_semantics=("parallel", "parallel"),
        ),
    )(x, w1t, b1p, w2tp, b2p, sel, shift)

    # Channel-major output feeds the NCHW slicing directly (no transpose needed).
    scores = out[:, :out_ch, :HW].reshape(B, out_ch, H, W)            # (B, 5A+C, H, W)
    anchor_data = scores[:, : 5 * A].reshape(B, A, 5, H, W)
    conf_scores = anchor_data[:, :, 0]          # sigmoided in-kernel    -> (B, A, H, W)
    offsets = anchor_data[:, :, 1:]             # xy already sigmoid-0.5 -> (B, A, 4, H, W)
    class_scores = scores[:, 5 * A:]            # (B, C, H, W)
    return conf_scores, offsets, class_scores


if __name__ == "__main__":
    # Small, deterministic setup consistent with the module: features are (B, in_dim, 7, 7).
    B, in_dim, H, W = 2, 64, 7, 7
    hidden_dim, num_anchors, num_classes = 128, 9, 20
    out_ch = 5 * num_anchors + num_classes

    key = jax.random.PRNGKey(0)
    k_feat, k_w1, k_b1, k_w2, k_b2 = jax.random.split(key, 5)

    features = jax.random.normal(k_feat, (B, in_dim, H, W), dtype=jnp.float32)
    # Deterministic synthetic parameters (Conv2d 1x1 weights stored as (Cin, Cout) matmul mats).
    w1 = 0.05 * jax.random.normal(k_w1, (in_dim, hidden_dim), dtype=jnp.float32)
    b1 = 0.05 * jax.random.normal(k_b1, (hidden_dim,), dtype=jnp.float32)
    w2 = 0.05 * jax.random.normal(k_w2, (hidden_dim, out_ch), dtype=jnp.float32)
    b2 = 0.05 * jax.random.normal(k_b2, (out_ch,), dtype=jnp.float32)

    conf_scores, offsets, class_scores = prediction_network_forward(
        features, w1, b1, w2, b2, num_anchors=num_anchors, num_classes=num_classes
    )
    jax.block_until_ready((conf_scores, offsets, class_scores))

    assert conf_scores.shape == (B, num_anchors, H, W)
    assert offsets.shape == (B, num_anchors, 4, H, W)
    assert class_scores.shape == (B, num_classes, H, W)

    # Sanity-check against a pure-JAX reference of the same math.
    x_flat = jnp.transpose(features, (0, 2, 3, 1)).reshape(-1, in_dim)
    h_ref = x_flat @ w1 + b1[None, :]
    h_ref = jnp.where(h_ref > 0, h_ref, 0.01 * h_ref)
    y_ref = h_ref @ w2 + b2[None, :]
    scores_ref = jnp.transpose(y_ref.reshape(B, H, W, out_ch), (0, 3, 1, 2))
    anch_ref = scores_ref[:, : 5 * num_anchors].reshape(B, num_anchors, 5, H, W)
    conf_ref = jax.nn.sigmoid(anch_ref[:, :, 0])
    off_ref = anch_ref[:, :, 1:]
    off_ref = off_ref.at[:, :, :2].set(jax.nn.sigmoid(off_ref[:, :, :2]) - 0.5)
    cls_ref = scores_ref[:, 5 * num_anchors:]

    assert jnp.allclose(conf_scores, conf_ref, atol=1e-4, rtol=1e-4)
    assert jnp.allclose(offsets, off_ref, atol=1e-4, rtol=1e-4)
    assert jnp.allclose(class_scores, cls_ref, atol=1e-4, rtol=1e-4)

    print("KERNEL_OK")
</pallas_src>

<mosaic_0001>
module attributes {stable_mosaic.version = 11 : i64} {
  func.func @_pred_kernel(%arg0: i32, %arg1: i32, %arg2: memref<1x64x128xf32, #tpu.memory_space<vmem>>, %arg3: memref<128x64xf32, #tpu.memory_space<vmem>>, %arg4: memref<128x1xf32, #tpu.memory_space<vmem>>, %arg5: memref<128x128xf32, #tpu.memory_space<vmem>>, %arg6: memref<128x1xf32, #tpu.memory_space<vmem>>, %arg7: memref<128x1xf32, #tpu.memory_space<vmem>>, %arg8: memref<128x1xf32, #tpu.memory_space<vmem>>, %arg9: memref<1x128x128xf32, #tpu.memory_space<vmem>>) attributes {dimension_semantics = [#tpu.dimension_semantics<parallel>, #tpu.dimension_semantics<parallel>], iteration_bounds = array<i64: 2, 1>, scalar_prefetch = 0 : i64, scratch_operands = 0 : i64, tpu.core_type = #tpu.core_type<tc>, window_params = [{transform_indices = @transform_0, window_bounds = array<i64: 1, 64, 128>}, {pipeline_mode = #tpu.pipeline_mode<synchronous>, transform_indices = @transform_1, window_bounds = array<i64: 128, 64>}, {pipeline_mode = #tpu.pipeline_mode<synchronous>, transform_indices = @transform_2, window_bounds = array<i64: 128, 1>}, {pipeline_mode = #tpu.pipeline_mode<synchronous>, transform_indices = @transform_3, window_bounds = array<i64: 128, 128>}, {pipeline_mode = #tpu.pipeline_mode<synchronous>, transform_indices = @transform_4, window_bounds = array<i64: 128, 1>}, {pipeline_mode = #tpu.pipeline_mode<synchronous>, transform_indices = @transform_5, window_bounds = array<i64: 128, 1>}, {pipeline_mode = #tpu.pipeline_mode<synchronous>, transform_indices = @transform_6, window_bounds = array<i64: 128, 1>}, {transform_indices = @transform_7, window_bounds = array<i64: 1, 128, 128>}]} {
    %c0 = arith.constant 0 : index
    %c0_0 = arith.constant 0 : index
    %c0_1 = arith.constant 0 : index
    %0 = vector.load %arg2[%c0, %c0_0, %c0_1] : memref<1x64x128xf32, #tpu.memory_space<vmem>>, vector<1x64x128xf32>
    %1 = vector.shape_cast %0 : vector<1x64x128xf32> to vector<64x128xf32>
    %c0_2 = arith.constant 0 : index
    %c0_3 = arith.constant 0 : index
    %2 = vector.load %arg3[%c0_2, %c0_3] : memref<128x64xf32, #tpu.memory_space<vmem>>, vector<128x64xf32>
    %cst = arith.constant dense<0.000000e+00> : vector<128x128xf32>
    %3 = tpu.matmul %2, %1, %cst {dimension_numbers = #tpu.dot_dimension_numbers<[1], [0], [0], [1], [0, 0, 1, 1], [], []>} : vector<128x64xf32>, vector<64x128xf32>, vector<128x128xf32> -> vector<128x128xf32>
    %c0_4 = arith.constant 0 : index
    %c0_5 = arith.constant 0 : index
    %4 = vector.load %arg4[%c0_4, %c0_5] : memref<128x1xf32, #tpu.memory_space<vmem>>, vector<128x1xf32>
    %5 = vector.broadcast %4 : vector<128x1xf32> to vector<128x128xf32>
    %6 = arith.addf %3, %5 : vector<128x128xf32>
    %cst_6 = arith.constant 0.000000e+00 : f32
    %7 = vector.broadcast %cst_6 : f32 to vector<128x128xf32>
    %8 = arith.cmpf ogt, %6, %7 : vector<128x128xf32>
    %cst_7 = arith.constant 0.00999999977 : f32
    %9 = vector.broadcast %cst_7 : f32 to vector<128x128xf32>
    %10 = arith.mulf %9, %6 : vector<128x128xf32>
    %11 = arith.select %8, %6, %10 : vector<128x128xi1>, vector<128x128xf32>
    %c0_8 = arith.constant 0 : index
    %c0_9 = arith.constant 0 : index
    %12 = vector.load %arg5[%c0_8, %c0_9] : memref<128x128xf32, #tpu.memory_space<vmem>>, vector<128x128xf32>
    %cst_10 = arith.constant dense<0.000000e+00> : vector<128x128xf32>
    %13 = tpu.matmul %12, %11, %cst_10 {dimension_numbers = #tpu.dot_dimension_numbers<[1], [0], [0], [1], [0, 0, 1, 1], [], []>} : vector<128x128xf32>, vector<128x128xf32>, vector<128x128xf32> -> vector<128x128xf32>
    %c0_11 = arith.constant 0 : index
    %c0_12 = arith.constant 0 : index
    %14 = vector.load %arg6[%c0_11, %c0_12] : memref<128x1xf32, #tpu.memory_space<vmem>>, vector<128x1xf32>
    %15 = vector.broadcast %14 : vector<128x1xf32> to vector<128x128xf32>
    %16 = arith.addf %13, %15 : vector<128x128xf32>
    %17 = arith.negf %16 : vector<128x128xf32>
    %18 = math.exp %17 : vector<128x128xf32>
    %cst_13 = arith.constant 1.000000e+00 : f32
    %19 = vector.broadcast %cst_13 : f32 to vector<128x128xf32>
    %20 = arith.addf %19, %18 : vector<128x128xf32>
    %21 = arith.divf %19, %20 : vector<128x128xf32>
    %c0_14 = arith.constant 0 : index
    %c0_15 = arith.constant 0 : index
    %22 = vector.load %arg8[%c0_14, %c0_15] : memref<128x1xf32, #tpu.memory_space<vmem>>, vector<128x1xf32>
    %23 = vector.broadcast %22 : vector<128x1xf32> to vector<128x128xf32>
    %24 = arith.subf %21, %23 : vector<128x128xf32>
    %c0_16 = arith.constant 0 : index
    %c0_17 = arith.constant 0 : index
    %25 = vector.load %arg7[%c0_16, %c0_17] : memref<128x1xf32, #tpu.memory_space<vmem>>, vector<128x1xf32>
    %cst_18 = arith.constant 0.000000e+00 : f32
    %26 = vector.broadcast %cst_18 : f32 to vector<128x1xf32>
    %27 = arith.cmpf ogt, %25, %26 : vector<128x1xf32>
    %28 = vector.shape_cast %27 : vector<128x1xi1> to vector<128x1xi1>
    %29 = vector.broadcast %28 : vector<128x1xi1> to vector<128x128xi1>
    %30 = arith.select %29, %24, %16 : vector<128x128xi1>, vector<128x128xf32>
    %c0_19 = arith.constant 0 : index
    %c0_20 = arith.constant 0 : index
    %c0_21 = arith.constant 0 : index
    %31 = vector.load %arg9[%c0_19, %c0_20, %c0_21] : memref<1x128x128xf32, #tpu.memory_space<vmem>>, vector<1x128x128xf32>
    %32 = vector.shape_cast %31 : vector<1x128x128xf32> to vector<128x128xf32>
    %33 = vector.shape_cast %30 : vector<128x128xf32> to vector<1x128x128xf32>
    tpu.vector_store %arg9[%c0_19, %c0_20, %c0_21], %33 {strides = array<i32>} : memref<1x128x128xf32, #tpu.memory_space<vmem>>, vector<1x128x128xf32>,
    return
  }
  func.func @transform_0(%arg0: i32, %arg1: i32) -> (i32, i32, i32) {
    %c0_i32 = arith.constant 0 : i32
    %c0_i32_0 = arith.constant 0 : i32
    return %arg0, %c0_i32, %arg1 : i32, i32, i32
  }
  func.func @transform_1(%arg0: i32, %arg1: i32) -> (i32, i32) {
    %c0_i32 = arith.constant 0 : i32
    %c0_i32_0 = arith.constant 0 : i32
    %c0_i32_1 = arith.constant 0 : i32
    return %c0_i32, %c0_i32_0 : i32, i32
  }
  func.func @transform_2(%arg0: i32, %arg1: i32) -> (i32, i32) {
    %c0_i32 = arith.constant 0 : i32
    %c0_i32_0 = arith.constant 0 : i32
    %c0_i32_1 = arith.constant 0 : i32
    return %c0_i32, %c0_i32_0 : i32, i32
  }
  func.func @transform_3(%arg0: i32, %arg1: i32) -> (i32, i32) {
    %c0_i32 = arith.constant 0 : i32
    %c0_i32_0 = arith.constant 0 : i32
    %c0_i32_1 = arith.constant 0 : i32
    return %c0_i32, %c0_i32_0 : i32, i32
  }
  func.func @transform_4(%arg0: i32, %arg1: i32) -> (i32, i32) {
    %c0_i32 = arith.constant 0 : i32
    %c0_i32_0 = arith.constant 0 : i32
    %c0_i32_1 = arith.constant 0 : i32
    return %c0_i32, %c0_i32_0 : i32, i32
  }
  func.func @transform_5(%arg0: i32, %arg1: i32) -> (i32, i32) {
    %c0_i32 = arith.constant 0 : i32
    %c0_i32_0 = arith.constant 0 : i32
    %c0_i32_1 = arith.constant 0 : i32
    return %c0_i32, %c0_i32_0 : i32, i32
  }
  func.func @transform_6(%arg0: i32, %arg1: i32) -> (i32, i32) {
    %c0_i32 = arith.constant 0 : i32
    %c0_i32_0 = arith.constant 0 : i32
    %c0_i32_1 = arith.constant 0 : i32
    return %c0_i32, %c0_i32_0 : i32, i32
  }
  func.func @transform_7(%arg0: i32, %arg1: i32) -> (i32, i32, i32) {
    %c0_i32 = arith.constant 0 : i32
    %c0_i32_0 = arith.constant 0 : i32
    return %arg0, %c0_i32, %arg1 : i32, i32, i32
  }
}

</mosaic_0001>

<bundles_post_ra>
// kernel: prediction_network_forward.1
= control target key start
LH: loop header
LB: loop body
LE: loop exit
PB: predicated region body
PF: predicated region fallthrough
CT: control target
= control target key end

     0   :  { %s1654_s24 = smov 0   ;;  %s1656_s25 = smov 0   ;;  %s2474_s0 = inlined_call_operand.vmem [shape: f32[2,64,128], index: 0, kind: input, shape index: {}]   ;;  %s2475_s1 = inlined_call_operand.vmem [shape: f32[128,64], index: 1, kind: input, shape index: {}]   ;;  %s2476_s2 = inlined_call_operand.vmem [shape: f32[128,1], index: 2, kind: input, shape index: {}]   ;;  %s2477_s3 = inlined_call_operand.vmem [shape: f32[128,128], index: 3, kind: input, shape index: {}]   ;;  %s2478_s4 = inlined_call_operand.vmem [shape: f32[128,1], index: 4, kind: input, shape index: {}]   ;;  %s2479_s5 = inlined_call_operand.vmem [shape: f32[128,1], index: 5, kind: input, shape index: {}]   ;;  %s2480_s6 = inlined_call_operand.vmem [shape: f32[128,1], index: 6, kind: input, shape index: {}]   ;;  %s2481_s7 = inlined_call_operand.vmem [shape: f32[2,128,128], index: 7, kind: output, shape index: {}]  }
   0x1   :  { %s1658_s26 = smov 0  }
   0x2 LB: > { %s29_s27 = sadd.s32 1, %s1607_s25  ;;  %p1416_p0 = scmp.ge.s32.totalorder %s1611_s26, 1  ;;  %s1611_s26 = sphi %s1658_s26, %s17_s26   ;;  %s1607_s25 = sphi %s1656_s25, %s2517_s25   ;;  %s1603_s24 = sphi %s1654_s24, %s2516_s24  }
   0x3   : > { %p31_p1 = scmp.ge.s32.totalorder %s29_s27, 2  ;;  %p256_p2 = scmp.lt.s32.totalorder %s1611_s26, 3 }
   0x5   : > { %s2519_s27 = smov (%p31_p1, %s29_s27), 0  ;;  %p257_p3 = pnand %p1416_p0, %p256_p2 }
   0x7   : > { %260 = sbr.rel (%p257_p3) target bundleno = 486 (0x1e6), region = 48 }
   0xc   : > { %v338_v0 = vld [vmem:[%s2476_s2 + $0x20] sm:$0xff]  ;;  %v336_v1 = vld [vmem:[%s2476_s2 + $0x10] sm:$0xff]  ;;  %p294_p4 = scmp.lt.s32.totalorder %s1603_s24, 1  ;;  %v1613_v3 = vmov 0   ;;  %v339_v6 = vld [vmem:[%s2476_s2 + $0x28] sm:$0xff]  ;;  %vm430_vm0 = vcmask 523264  }
   0xd   : > { %v334_v2 = vld [vmem:[%s2476_s2] sm:$0xff]  ;;  %1524 = vset.pattern.permute.xlu2 %v1613_v3  ;;  %1523 = vset.pattern.permute.xlu1 %v1613_v3  ;;  %v337_v7 = vld [vmem:[%s2476_s2 + $0x18] sm:$0xff]  ;;  %v335_v8 = vld [vmem:[%s2476_s2 + $0x8] sm:$0xff] }
   0xe   : > { %1522 = vset.pattern.permute.xlu0 %v1613_v3  ;;  %372 = vperm.xlu2 %1524, %v338_v0   ;;  %s2521_s24 = smov (!%p294_p4, %s1603_s24), 1  ;;  %v342_v13 = vld [vmem:[%s2476_s2 + $0x40] sm:$0xff]  ;;  %v341_v14 = vld [vmem:[%s2476_s2 + $0x38] sm:$0xff]  ;;  %v340_v15 = vld [vmem:[%s2476_s2 + $0x30] sm:$0xff] }
   0xf   : > { %362 = vperm.xlu1 %1523, %v336_v1   ;;  %352 = vperm.xlu0 %1522, %v334_v2   ;;  %s1455_s11 = sshll.u32 %s2521_s24, 6  ;;  %v318_v18 = vld [vmem:[%s2475_s1] sm:$0xff]  ;;  %v327_v19 = vld [vmem:[%s2475_s1 + $0x48] sm:$0xff]  ;;  %v345_v20 = vld [vmem:[%s2476_s2 + $0x58] sm:$0xff] }
  0x10   : > { %s1690_s14 = scalar_lea.vmem %s2474_s0, %s1455_s11  ;;  %v344_v21 = vld [vmem:[%s2476_s2 + $0x50] sm:$0xff]  ;;  %v343_v22 = vld [vmem:[%s2476_s2 + $0x48] sm:$0xff]  ;;  %v346_v27 = vld [vmem:[%s2476_s2 + $0x60] sm:$0xff]  ;;  %s1456_s11 = sshll.u32 %s2521_s24, 7 }
  0x11   : > { %v317_v4 = vld [vmem:[%s1690_s14 + $0x38] sm:$0xff]  ;;  %v316_v5 = vld [vmem:[%s1690_s14 + $0x30] sm:$0xff]  ;;  %v315_v9 = vld [vmem:[%s1690_s14 + $0x28] sm:$0xff]  ;;  %s2199_s13 = scalar_lea.vmem %s2481_s7, %s1456_s11 }
  0x12   : > { %487 = vmatpush.msra.mxu0 %v317_v4  ;;  %1457 = vmatpush.msra.mxu3 %v317_v4  ;;  %v314_v10 = vld [vmem:[%s1690_s14 + $0x20] sm:$0xff]  ;;  %v313_v11 = vld [vmem:[%s1690_s14 + $0x18] sm:$0xff]  ;;  %v312_v12 = vld [vmem:[%s1690_s14 + $0x10] sm:$0xff] }
  0x13   : > { %v311_v16 = vld [vmem:[%s1690_s14 + $0x8] sm:$0xff]  ;;  %v310_v17 = vld [vmem:[%s1690_s14] sm:$0xff]  ;;  %v328_v24 = vld [vmem:[%s2475_s1 + $0x50] sm:$0xff] }
  0x14   : > { %488 = vmatpush.msra.mxu0 %v316_v5  ;;  %1458 = vmatpush.msra.mxu3 %v316_v5  ;;  %v319_v23 = vld [vmem:[%s2475_s1 + $0x8] sm:$0xff]  ;;  %v348_v25 = vld [vmem:[%s2476_s2 + $0x70] sm:$0xff]  ;;  %v329_v29 = vld [vmem:[%s2475_s1 + $0x58] sm:$0xff] }
  0x15   : > { %v347_v26 = vld [vmem:[%s2476_s2 + $0x68] sm:$0xff]  ;;  %v320_v28 = vld [vmem:[%s2475_s1 + $0x10] sm:$0xff]  ;;  %v608_v31 = vld [vmem:[%s2478_s4] sm:$0xff] }
  0x16   : > { %377 = vperm.xlu2 %1524, %v339_v6   ;;  %489 = vmatpush.msra.mxu0 %v315_v9  ;;  %v609_v30 = vld [vmem:[%s2478_s4 + $0x8] sm:$0xff]  ;;  %v349_v32 = vld [vmem:[%s2476_s2 + $0x78] sm:$0xff]  ;;  %v330_v34 = vld [vmem:[%s2475_s1 + $0x60] sm:$0xff] }
  0x17   : > { %367 = vperm.xlu1 %1523, %v337_v7   ;;  %357 = vperm.xlu0 %1522, %v335_v8   ;;  %v321_v33 = vld [vmem:[%s2475_s1 + $0x18] sm:$0xff]  ;;  %v612_v35 = vld [vmem:[%s2478_s4 + $0x20] sm:$0xff]  ;;  %v610_v37 = vld [vmem:[%s2478_s4 + $0x10] sm:$0xff] }
  0x18   : > { %1459 = vmatpush.msra.mxu3 %v315_v9  ;;  %490 = vmatpush.msra.mxu0 %v314_v10  ;;  %v611_v36 = vld [vmem:[%s2478_s4 + $0x18] sm:$0xff]  ;;  %v322_v38 = vld [vmem:[%s2475_s1 + $0x20] sm:$0xff]  ;;  %v331_v39 = vld [vmem:[%s2475_s1 + $0x68] sm:$0xff] }
  0x19   : > { %v615_v40 = vld [vmem:[%s2478_s4 + $0x38] sm:$0xff]  ;;  %v614_v41 = vld [vmem:[%s2478_s4 + $0x30] sm:$0xff]  ;;  %v613_v42 = vld [vmem:[%s2478_s4 + $0x28] sm:$0xff] }
  0x1a   : > { %1460 = vmatpush.msra.mxu3 %v314_v10  ;;  %491 = vmatpush.msra.mxu0 %v313_v11  ;;  %v323_v43 = vld [vmem:[%s2475_s1 + $0x28] sm:$0xff]  ;;  %v332_v44 = vld [vmem:[%s2475_s1 + $0x70] sm:$0xff]  ;;  %v616_v47 = vld [vmem:[%s2478_s4 + $0x40] sm:$0xff] }
  0x1b   : > { %v618_v45 = vld [vmem:[%s2478_s4 + $0x50] sm:$0xff]  ;;  %v617_v46 = vld [vmem:[%s2478_s4 + $0x48] sm:$0xff]  ;;  %v333_v49 = vld [vmem:[%s2475_s1 + $0x78] sm:$0xff] }
  0x1c   : > { %1461 = vmatpush.msra.mxu3 %v313_v11  ;;  %492 = vmatpush.msra.mxu0 %v312_v12  ;;  %v324_v48 = vld [vmem:[%s2475_s1 + $0x30] sm:$0xff]  ;;  %v621_v50 = vld [vmem:[%s2478_s4 + $0x68] sm:$0xff]  ;;  %v620_v51 = vld [vmem:[%s2478_s4 + $0x60] sm:$0xff] }
  0x1d   : > { %v619_v52 = vld [vmem:[%s2478_s4 + $0x58] sm:$0xff]  ;;  %v1073_v54 = vld [vmem:[%s2480_s6] sm:$0xff]  ;;  %v622_v56 = vld [vmem:[%s2478_s4 + $0x70] sm:$0xff] }
  0x1e   : > { %1462 = vmatpush.msra.mxu3 %v312_v12  ;;  %392 = vperm.xlu2 %1524, %v342_v13   ;;  %v325_v53 = vld [vmem:[%s2475_s1 + $0x38] sm:$0xff]  ;;  %v326_v57 = vld [vmem:[%s2475_s1 + $0x40] sm:$0xff]  ;;  %v1075_v59 = vld [vmem:[%s2480_s6 + $0x10] sm:$0xff] }
  0x1f   : > { %387 = vperm.xlu1 %1523, %v341_v14   ;;  %382 = vperm.xlu0 %1522, %v340_v15   ;;  %v623_v55 = vld [vmem:[%s2478_s4 + $0x78] sm:$0xff]  ;;  %v1074_v60 = vld [vmem:[%s2480_s6 + $0x8] sm:$0xff]  ;;  %v1079_v61 = vld [vmem:[%s2480_s6 + $0x30] sm:$0xff] }
  0x20   : > { %493 = vmatpush.msra.mxu0 %v311_v16  ;;  %1463 = vmatpush.msra.mxu3 %v311_v16  ;;  %v1076_v58 = vld [vmem:[%s2480_s6 + $0x18] sm:$0xff]  ;;  %v1078_v62 = vld [vmem:[%s2480_s6 + $0x28] sm:$0xff]  ;;  %v1077_v63 = vld [vmem:[%s2480_s6 + $0x20] sm:$0xff] }
  0x21   : > { %v1082_v0 = vld [vmem:[%s2480_s6 + $0x48] sm:$0xff]  ;;  %v1081_v1 = vld [vmem:[%s2480_s6 + $0x40] sm:$0xff]  ;;  %v1080_v2 = vld [vmem:[%s2480_s6 + $0x38] sm:$0xff] }
  0x22   : > { %494 = vmatpush.msra.mxu0 %v310_v17  ;;  %1464 = vmatpush.msra.mxu3 %v310_v17  ;;  %v1085_v4 = vld [vmem:[%s2480_s6 + $0x60] sm:$0xff]  ;;  %v1084_v5 = vld [vmem:[%s2480_s6 + $0x58] sm:$0xff]  ;;  %v1083_v6 = vld [vmem:[%s2480_s6 + $0x50] sm:$0xff] }
  0x23   : > { %1421 = vmatmul.msk.f32.vlgmr.msra.gmra.mxu0 %vm430_vm0, %v318_v18  ;;  %1430 = vmatmul.msk.f32.vlgmr.msra.gmra.mxu3 %vm430_vm0, %v327_v19  ;;  %v1088_v7 = vld [vmem:[%s2480_s6 + $0x78] sm:$0xff]  ;;  %v1087_v8 = vld [vmem:[%s2480_s6 + $0x70] sm:$0xff]  ;;  %v1086_v9 = vld [vmem:[%s2480_s6 + $0x68] sm:$0xff] }
  0x24   : > { %v1187_v10 = vld [vmem:[%s2479_s5 + $0x10] sm:$0xff]  ;;  %v1186_v11 = vld [vmem:[%s2479_s5 + $0x8] sm:$0xff]  ;;  %v1185_v12 = vld [vmem:[%s2479_s5] sm:$0xff] }
  0x25   : > { %vm1203_vm1 = vcmp.gt.f32.partialorder %v1187_v10, 0.0  ;;  %vm1202_vm2 = vcmp.gt.f32.partialorder %v1186_v11, 0.0  ;;  %vm1201_vm3 = vcmp.gt.f32.partialorder %v1185_v12, 0.0  ;;  %v1190_v16 = vld [vmem:[%s2479_s5 + $0x28] sm:$0xff]  ;;  %v1189_v17 = vld [vmem:[%s2479_s5 + $0x20] sm:$0xff]  ;;  %v1188_v18 = vld [vmem:[%s2479_s5 + $0x18] sm:$0xff] }
  0x26   : > { %407 = vperm.xlu2 %1524, %v345_v20   ;;  %v1219_v13 = vsel %vm1203_vm1, 1, %v1613_v3  ;;  %v1218_v14 = vsel %vm1202_vm2, 1, %v1613_v3  ;;  %v1217_v15 = vsel %vm1201_vm3, 1, %v1613_v3  ;;  %vm1206_vm4 = vcmp.gt.f32.partialorder %v1190_v16, 0.0 }
  0x27   : > { %402 = vperm.xlu1 %1523, %v344_v21   ;;  %397 = vperm.xlu0 %1522, %v343_v22   ;;  %vm1205_vm5 = vcmp.gt.f32.partialorder %v1189_v17, 0.0  ;;  %vm1204_vm6 = vcmp.gt.f32.partialorder %v1188_v18, 0.0  ;;  %v1222_v19 = vsel %vm1206_vm4, 1, %v1613_v3  ;;  %v1193_v22 = vld [vmem:[%s2479_s5 + $0x40] sm:$0xff] }
  0x28   : > { %v1221_v20 = vsel %vm1205_vm5, 1, %v1613_v3  ;;  %v1220_v21 = vsel %vm1204_vm6, 1, %v1613_v3  ;;  %vm1209_vm7 = vcmp.gt.f32.partialorder %v1193_v22, 0.0 }
  0x2b   : > { %1422 = vmatmul.msk.f32.gmra.mxu0 %vm430_vm0, %v319_v23  ;;  %1431 = vmatmul.msk.f32.gmra.mxu3 %vm430_vm0, %v328_v24  ;;  %v1192_v23 = vld [vmem:[%s2479_s5 + $0x38] sm:$0xff]  ;;  %v1191_v24 = vld [vmem:[%s2479_s5 + $0x30] sm:$0xff] }
  0x2c   : > { %vm1208_vm8 = vcmp.gt.f32.partialorder %v1192_v23, 0.0  ;;  %vm1207_vm9 = vcmp.gt.f32.partialorder %v1191_v24, 0.0 }
  0x2e   : > { %422 = vperm.xlu2 %1524, %v348_v25   ;;  %v1225_v25 = vsel %vm1209_vm7, 1, %v1613_v3 }
  0x2f   : > { %417 = vperm.xlu1 %1523, %v347_v26   ;;  %412 = vperm.xlu0 %1522, %v346_v27   ;;  %v1224_v26 = vsel %vm1208_vm8, 1, %v1613_v3  ;;  %v1223_v27 = vsel %vm1207_vm9, 1, %v1613_v3 }
  0x33   : > { %1423 = vmatmul.msk.f32.gmra.mxu0 %vm430_vm0, %v320_v28  ;;  %1432 = vmatmul.msk.f32.gmra.mxu3 %vm430_vm0, %v329_v29  ;;  %v1196_v28 = vld [vmem:[%s2479_s5 + $0x58] sm:$0xff]  ;;  %v1195_v29 = vld [vmem:[%s2479_s5 + $0x50] sm:$0xff] }
  0x34   : > { %vm1212_vm10 = vcmp.gt.f32.partialorder %v1196_v28, 0.0  ;;  %vm1211_vm11 = vcmp.gt.f32.partialorder %v1195_v29, 0.0 }
  0x36   : > { %631 = vperm.xlu2 %1524, %v609_v30   ;;  %v1194_v30 = vld [vmem:[%s2479_s5 + $0x48] sm:$0xff] }
  0x37   : > { %626 = vperm.xlu1 %1523, %v608_v31   ;;  %427 = vperm.xlu0 %1522, %v349_v32   ;;  %vm1210_vm12 = vcmp.gt.f32.partialorder %v1194_v30, 0.0 }
  0x3b   : > { %1424 = vmatmul.msk.f32.gmra.mxu0 %vm430_vm0, %v321_v33  ;;  %1433 = vmatmul.msk.f32.gmra.mxu3 %vm430_vm0, %v330_v34  ;;  %v1228_v34 = vsel %vm1212_vm10, 1, %v1613_v3 }
  0x3e   : > { %646 = vperm.xlu2 %1524, %v612_v35   ;;  %v1227_v35 = vsel %vm1211_vm11, 1, %v1613_v3 }
  0x3f   : > { %641 = vperm.xlu1 %1523, %v611_v36   ;;  %636 = vperm.xlu0 %1522, %v610_v37   ;;  %v1226_v36 = vsel %vm1210_vm12, 1, %v1613_v3  ;;  %v1199_v37 = vld [vmem:[%s2479_s5 + $0x70] sm:$0xff] }
  0x40   : > { %vm1215_vm13 = vcmp.gt.f32.partialorder %v1199_v37, 0.0 }
  0x43   : > { %1425 = vmatmul.msk.f32.gmra.mxu0 %vm430_vm0, %v322_v38  ;;  %1434 = vmatmul.msk.f32.gmra.mxu3 %vm430_vm0, %v331_v39  ;;  %v1198_v38 = vld [vmem:[%s2479_s5 + $0x68] sm:$0xff] }
  0x44   : > { %vm1214_vm14 = vcmp.gt.f32.partialorder %v1198_v38, 0.0 }
  0x46   : > { %661 = vperm.xlu2 %1524, %v615_v40   ;;  %v1197_v40 = vld [vmem:[%s2479_s5 + $0x60] sm:$0xff] }
  0x47   : > { %656 = vperm.xlu1 %1523, %v614_v41   ;;  %651 = vperm.xlu0 %1522, %v613_v42   ;;  %vm1213_vm15 = vcmp.gt.f32.partialorder %v1197_v40, 0.0  ;;  %v1231_v42 = vsel %vm1215_vm13, 1, %v1613_v3 }
  0x4b   : > { %1426 = vmatmul.msk.f32.gmra.mxu0 %vm430_vm0, %v323_v43  ;;  %1435 = vmatmul.msk.f32.gmra.mxu3 %vm430_vm0, %v332_v44  ;;  %v1230_v43 = vsel %vm1214_vm14, 1, %v1613_v3 }
  0x4e   : > { %676 = vperm.xlu2 %1524, %v618_v45   ;;  %v1229_v45 = vsel %vm1213_vm15, 1, %v1613_v3 }
  0x4f   : > { %671 = vperm.xlu1 %1523, %v617_v46   ;;  %666 = vperm.xlu0 %1522, %v616_v47  }
  0x53   : > { %1427 = vmatmul.msk.f32.gmra.mxu0 %vm430_vm0, %v324_v48  ;;  %1436 = vmatmul.msk.f32.gmra.mxu3 %vm430_vm0, %v333_v49  ;;  %v1200_v49 = vld [vmem:[%s2479_s5 + $0x78] sm:$0xff] }
  0x56   : > { %691 = vperm.xlu2 %1524, %v621_v50  }
  0x57   : > { %686 = vperm.xlu1 %1523, %v620_v51   ;;  %681 = vperm.xlu0 %1522, %v619_v52  }
  0x5b   : > { %1428 = vmatmul.msk.f32.gmra.mxu0 %vm430_vm0, %v325_v53 }
  0x5e   : > { %1091 = vperm.xlu2 %1524, %v1073_v54  }
  0x5f   : > { %701 = vperm.xlu1 %1523, %v623_v55   ;;  %696 = vperm.xlu0 %1522, %v622_v56  }
  0x63   : > { %1429 = vmatmul.msk.f32.gmra.mxu0 %vm430_vm0, %v326_v57  ;;  %vm1216_vm0 = vcmp.gt.f32.partialorder %v1200_v49, 0.0 }
  0x64   : > { %v1232_v51 = vsel %vm1216_vm0, 1, %v1613_v3 }
  0x66   : > { %1106 = vperm.xlu2 %1524, %v1076_v58  }
  0x67   : > { %1101 = vperm.xlu1 %1523, %v1075_v59   ;;  %1096 = vperm.xlu0 %1522, %v1074_v60  }
  0x68   : > { %v1964_v44 = vpop.permute.xlu2 %372 }
  0x6e   : > { %1121 = vperm.xlu2 %1524, %v1079_v61  }
  0x6f   : > { %1116 = vperm.xlu1 %1523, %v1078_v62   ;;  %1111 = vperm.xlu0 %1522, %v1077_v63  }
  0x70   : > { %v1977_v52 = vpop.permute.xlu2 %377 }
  0x76   : > { %1136 = vperm.xlu2 %1524, %v1082_v0  }
  0x77   : > { %1131 = vperm.xlu1 %1523, %v1081_v1   ;;  %1126 = vperm.xlu0 %1522, %v1080_v2  }
  0x78   : > { %v393_v59 = vpop.permute.xlu2 %392 }
  0x7e   : > { %1151 = vperm.xlu2 %1524, %v1085_v4  }
  0x7f   : > { %1146 = vperm.xlu1 %1523, %v1084_v5   ;;  %1141 = vperm.xlu0 %1522, %v1083_v6  }
  0x80   : > { %v408_v0 = vpop.permute.xlu2 %407 }
  0x81   : > { %v353_v31 = vpop.permute.xlu0 %352  ;;  %v1967_v46 = vpop.permute.xlu1 %362 }
  0x86   : > { %1166 = vperm.xlu2 %1524, %v1088_v7  }
  0x87   : > { %1161 = vperm.xlu1 %1523, %v1087_v8   ;;  %1156 = vperm.xlu0 %1522, %v1086_v9  }
  0x88   : > { %v423_v5 = vpop.permute.xlu2 %422 }
  0x89   : > { %v1969_v47 = vpop.permute.xlu0 %357  ;;  %v1979_v54 = vpop.permute.xlu1 %367 }
  0x8e   : > { %1240 = vperm.xlu2 %1524, %v1219_v13  }
  0x8f   : > { %1237 = vperm.xlu1 %1523, %v1218_v14   ;;  %1234 = vperm.xlu0 %1522, %v1217_v15  }
  0x91   : > { %v383_v56 = vpop.permute.xlu0 %382  ;;  %v388_v60 = vpop.permute.xlu1 %387 }
  0x96   : > { %1249 = vperm.xlu2 %1524, %v1222_v19  }
  0x97   : > { %1246 = vperm.xlu1 %1523, %v1221_v20   ;;  %1243 = vperm.xlu0 %1522, %v1220_v21  }
  0x99   : > { %v398_v61 = vpop.permute.xlu0 %397  ;;  %v403_v1 = vpop.permute.xlu1 %402 }
  0x9e   : > { %1258 = vperm.xlu2 %1524, %v1225_v25  }
  0x9f   : > { %1255 = vperm.xlu1 %1523, %v1224_v26   ;;  %1252 = vperm.xlu0 %1522, %v1223_v27  }
  0xa0   : > { %v496_v32 = vpop.f32.mrf.mxu0 }
  0xa1   : > { %v1944_v33 = vadd.f32 %v496_v32, %v353_v31  ;;  %v413_v3 = vpop.permute.xlu0 %412  ;;  %v418_v6 = vpop.permute.xlu1 %417 }
  0xa3   : > { %vm544_vm0 = vcmp.gt.f32.partialorder %v1944_v33, 0.0 }
  0xa6   : > { %v1955_v39 = vpop.f32.mrf.mxu3  ;;  %1267 = vperm.xlu2 %1524, %v1228_v34  }
  0xa7   : > { %1264 = vperm.xlu1 %1523, %v1227_v35   ;;  %1261 = vperm.xlu0 %1522, %v1226_v36   ;;  %v524_v22 = vadd.f32 %v1955_v39, %v398_v61  ;;  %v606_v61 = vld [vmem:[%s2477_s3 + $0x70] sm:$0xff] }
  0xa8   : > { %v1960_v41 = vpop.f32.mrf.mxu0 }
  0xa9   : > { %v428_v8 = vpop.permute.xlu0 %427  ;;  %v569_v29 = vmul.f32 0.01, %v524_v22  ;;  %vm553_vm7 = vcmp.gt.f32.partialorder %v524_v22, 0.0 }
  0xab   : > { %v585_v38 = vsel %vm553_vm7, %v524_v22, %v569_v29 }
  0xae   : > { %v526_v48 = vpop.f32.mrf.mxu3  ;;  %1276 = vperm.xlu2 %1524, %v1231_v42  }
  0xaf   : > { %1273 = vperm.xlu1 %1523, %v1230_v43   ;;  %1270 = vperm.xlu0 %1522, %v1229_v45   ;;  %v527_v19 = vadd.f32 %v526_v48, %v403_v1  ;;  %v594_v1 = vld [vmem:[%s2477_s3 + $0x10] sm:$0xff] }
  0xb0   : > { %v1974_v50 = vpop.f32.mrf.mxu0 }
  0xb1   : > { %v570_v26 = vmul.f32 0.01, %v527_v19  ;;  %vm554_vm6 = vcmp.gt.f32.partialorder %v527_v19, 0.0  ;;  %v503_v49 = vadd.f32 %v1974_v50, %v1967_v46 }
  0xb3   : > { %v586_v35 = vsel %vm554_vm6, %v527_v19, %v570_v26  ;;  %vm546_vm14 = vcmp.gt.f32.partialorder %v503_v49, 0.0  ;;  %v598_v19 = vld [vmem:[%s2477_s3 + $0x30] sm:$0xff] }
  0xb6   : > { %v529_v53 = vpop.f32.mrf.mxu3 }
  0xb7   : > { %1279 = vperm.xlu0 %1522, %v1232_v51   ;;  %v530_v16 = vadd.f32 %v529_v53, %v408_v0  ;;  %v607_v0 = vld [vmem:[%s2477_s3 + $0x78] sm:$0xff] }
  0xb8   : > { %v1981_v55 = vpop.f32.mrf.mxu0 }
  0xb9   : > { %v571_v23 = vmul.f32 0.01, %v530_v16  ;;  %vm555_vm5 = vcmp.gt.f32.partialorder %v530_v16, 0.0  ;;  %v506_v43 = vadd.f32 %v1981_v55, %v1979_v54  ;;  %v562_v55 = vmul.f32 0.01, %v503_v49 }
  0xbb   : > { %v587_v31 = vsel %vm555_vm5, %v530_v16, %v571_v23  ;;  %v563_v53 = vmul.f32 0.01, %v506_v43  ;;  %vm547_vm13 = vcmp.gt.f32.partialorder %v506_v43, 0.0 }
  0xbd   : > { %v579_v50 = vsel %vm547_vm13, %v506_v43, %v563_v53 }
  0xbe   : > { %v532_v57 = vpop.f32.mrf.mxu3 }
  0xbf   : > { %v533_v13 = vadd.f32 %v532_v57, %v413_v3 }
  0xc0   : > { %v1983_v58 = vpop.f32.mrf.mxu0 }
  0xc1   : > { %v572_v20 = vmul.f32 0.01, %v533_v13  ;;  %vm556_vm4 = vcmp.gt.f32.partialorder %v533_v13, 0.0  ;;  %v509_v39 = vadd.f32 %v1983_v58, %v1964_v44  ;;  %v592_v58 = vld [vmem:[%s2477_s3] sm:$0xff] }
  0xc3   : > { %v588_v28 = vsel %vm556_vm4, %v533_v13, %v572_v20  ;;  %v564_v51 = vmul.f32 0.01, %v509_v39  ;;  %vm548_vm12 = vcmp.gt.f32.partialorder %v509_v39, 0.0  ;;  %v605_v20 = vld [vmem:[%s2477_s3 + $0x68] sm:$0xff] }
  0xc6   : > { %v535_v62 = vpop.f32.mrf.mxu3 }
  0xc7   : > { %v536_v10 = vadd.f32 %v535_v62, %v418_v6  ;;  %v2007_v62 = vpop.permute.xlu2 %631  ;;  %v602_v6 = vld [vmem:[%s2477_s3 + $0x50] sm:$0xff] }
  0xc8   : > { %v511_v63 = vpop.f32.mrf.mxu0 }
  0xc9   : > { %v573_v17 = vmul.f32 0.01, %v536_v10  ;;  %vm557_vm3 = vcmp.gt.f32.partialorder %v536_v10, 0.0  ;;  %v512_v36 = vadd.f32 %v511_v63, %v1977_v52  ;;  %v500_v52 = vadd.f32 %v1960_v41, %v1969_v47  ;;  %v600_v63 = vld [vmem:[%s2477_s3 + $0x40] sm:$0xff] }
  0xca   : > { %v560_v41 = vmul.f32 0.01, %v1944_v33  ;;  %v578_v47 = vsel %vm546_vm14, %v503_v49, %v562_v55 }
  0xcb   : > { %v589_v25 = vsel %vm557_vm3, %v536_v10, %v573_v17  ;;  %v565_v45 = vmul.f32 0.01, %v512_v36  ;;  %vm549_vm11 = vcmp.gt.f32.partialorder %v512_v36, 0.0  ;;  %v561_v46 = vmul.f32 0.01, %v500_v52  ;;  %v603_v10 = vld [vmem:[%s2477_s3 + $0x58] sm:$0xff] }
  0xcc   : > { %vm545_vm15 = vcmp.gt.f32.partialorder %v500_v52, 0.0 }
  0xcd   : > { %v581_v54 = vsel %vm549_vm11, %v512_v36, %v565_v45  ;;  %v577_v57 = vsel %vm545_vm15, %v500_v52, %v561_v46 }
  0xce   : > { %v538_v2 = vpop.f32.mrf.mxu3 }
  0xcf   : > { %v539_v7 = vadd.f32 %v538_v2, %v423_v5  ;;  %v2021_v3 = vpop.permute.xlu2 %646  ;;  %v601_v2 = vld [vmem:[%s2477_s3 + $0x48] sm:$0xff]  ;;  %v595_v5 = vld [vmem:[%s2477_s3 + $0x18] sm:$0xff] }
  0xd0   : > { %v514_v4 = vpop.f32.mrf.mxu0 }
  0xd1   : > { %v574_v14 = vmul.f32 0.01, %v539_v7  ;;  %vm558_vm2 = vcmp.gt.f32.partialorder %v539_v7, 0.0  ;;  %v515_v32 = vadd.f32 %v514_v4, %v383_v56  ;;  %v580_v56 = vsel %vm548_vm12, %v509_v39, %v564_v51  ;;  %v627_v4 = vpop.permute.xlu1 %626 }
  0xd3   : > { %v590_v21 = vsel %vm558_vm2, %v539_v7, %v574_v14  ;;  %v566_v40 = vmul.f32 0.01, %v515_v32  ;;  %vm550_vm10 = vcmp.gt.f32.partialorder %v515_v32, 0.0  ;;  %v2032_v7 = vpop.permute.xlu0 %636  ;;  %v597_v14 = vld [vmem:[%s2477_s3 + $0x28] sm:$0xff] }
  0xd5   : > { %v582_v44 = vsel %vm550_vm10, %v515_v32, %v566_v40 }
  0xd6   : > { %v541_v9 = vpop.f32.mrf.mxu3 }
  0xd7   : > { %v542_v11 = vadd.f32 %v541_v9, %v428_v8  ;;  %v662_v8 = vpop.permute.xlu2 %661  ;;  %v596_v9 = vld [vmem:[%s2477_s3 + $0x20] sm:$0xff] }
  0xd8   : > { %v517_v12 = vpop.f32.mrf.mxu0 }
  0xd9   : > { %v575_v15 = vmul.f32 0.01, %v542_v11  ;;  %vm559_vm1 = vcmp.gt.f32.partialorder %v542_v11, 0.0  ;;  %v518_v30 = vadd.f32 %v517_v12, %v388_v60  ;;  %v599_v60 = vld [vmem:[%s2477_s3 + $0x38] sm:$0xff] }
  0xdb   : > { %v591_v18 = vsel %vm559_vm1, %v542_v11, %v575_v15  ;;  %v567_v37 = vmul.f32 0.01, %v518_v30  ;;  %vm551_vm9 = vcmp.gt.f32.partialorder %v518_v30, 0.0  ;;  %v2040_v11 = vpop.permute.xlu1 %641  ;;  %v2042_v12 = vpop.permute.xlu0 %651  ;;  %v604_v15 = vld [vmem:[%s2477_s3 + $0x60] sm:$0xff] }
  0xdc   : > { %704 = vmatpush.msra.mxu1 %v591_v18  ;;  %1465 = vmatpush.msra.mxu2 %v591_v18 }
  0xdd   : > { %1466 = vmatpush.msrb.mxu3 %v591_v18  ;;  %v583_v48 = vsel %vm551_vm9, %v518_v30, %v567_v37 }
  0xde   : > { %705 = vmatpush.msra.mxu1 %v590_v21  ;;  %1467 = vmatpush.msra.mxu2 %v590_v21 }
  0xdf   : > { %1468 = vmatpush.msrb.mxu3 %v590_v21  ;;  %v2044_v13 = vpop.permute.xlu2 %676 }
  0xe0   : > { %v520_v24 = vpop.f32.mrf.mxu0  ;;  %706 = vmatpush.msra.mxu1 %v589_v25  ;;  %1469 = vmatpush.msra.mxu2 %v589_v25 }
  0xe1   : > { %v521_v27 = vadd.f32 %v520_v24, %v393_v59  ;;  %1470 = vmatpush.msrb.mxu3 %v589_v25  ;;  %v576_v59 = vsel %vm544_vm0, %v1944_v33, %v560_v41  ;;  %v593_v33 = vld [vmem:[%s2477_s3 + $0x8] sm:$0xff] }
  0xe2   : > { %707 = vmatpush.msra.mxu1 %v588_v28  ;;  %1471 = vmatpush.msra.mxu2 %v588_v28 }
  0xe3   : > { %1472 = vmatpush.msrb.mxu3 %v588_v28  ;;  %v568_v34 = vmul.f32 0.01, %v521_v27  ;;  %vm552_vm8 = vcmp.gt.f32.partialorder %v521_v27, 0.0  ;;  %v2052_v16 = vpop.permute.xlu1 %656  ;;  %v667_v17 = vpop.permute.xlu0 %666 }
  0xe4   : > { %708 = vmatpush.msra.mxu1 %v587_v31  ;;  %1473 = vmatpush.msra.mxu2 %v587_v31 }
  0xe5   : > { %1474 = vmatpush.msrb.mxu3 %v587_v31  ;;  %v584_v42 = vsel %vm552_vm8, %v521_v27, %v568_v34 }
  0xe6   : > { %709 = vmatpush.msra.mxu1 %v586_v35  ;;  %1475 = vmatpush.msra.mxu2 %v586_v35 }
  0xe7   : > { %1476 = vmatpush.msrb.mxu3 %v586_v35  ;;  %v2054_v18 = vpop.permute.xlu2 %691 }
  0xe8   : > { %710 = vmatpush.msra.mxu1 %v585_v38  ;;  %1477 = vmatpush.msra.mxu2 %v585_v38 }
  0xe9   : > { %1478 = vmatpush.msrb.mxu3 %v585_v38 }
  0xea   : > { %711 = vmatpush.msra.mxu1 %v584_v42  ;;  %1479 = vmatpush.msra.mxu2 %v584_v42 }
  0xeb   : > { %1480 = vmatpush.msrb.mxu3 %v584_v42  ;;  %v2062_v21 = vpop.permute.xlu1 %671  ;;  %v2064_v22 = vpop.permute.xlu0 %681 }
  0xec   : > { %712 = vmatpush.msra.mxu1 %v583_v48  ;;  %1481 = vmatpush.msra.mxu2 %v583_v48 }
  0xed   : > { %1482 = vmatpush.msrb.mxu3 %v583_v48 }
  0xee   : > { %713 = vmatpush.msra.mxu1 %v582_v44  ;;  %1483 = vmatpush.msra.mxu2 %v582_v44 }
  0xef   : > { %1484 = vmatpush.msrb.mxu3 %v582_v44  ;;  %v2066_v23 = vpop.permute.xlu2 %1091 }
  0xf0   : > { %714 = vmatpush.msra.mxu1 %v581_v54  ;;  %1485 = vmatpush.msra.mxu2 %v581_v54 }
  0xf1   : > { %1486 = vmatpush.msrb.mxu3 %v581_v54 }
  0xf2   : > { %715 = vmatpush.msra.mxu1 %v580_v56  ;;  %1487 = vmatpush.msra.mxu2 %v580_v56 }
  0xf3   : > { %1488 = vmatpush.msrb.mxu3 %v580_v56  ;;  %v2068_v24 = vpop.permute.xlu1 %686  ;;  %v697_v25 = vpop.permute.xlu0 %696 }
  0xf4   : > { %716 = vmatpush.msra.mxu1 %v579_v50  ;;  %1489 = vmatpush.msra.mxu2 %v579_v50 }
  0xf5   : > { %1490 = vmatpush.msrb.mxu3 %v579_v50 }
  0xf6   : > { %717 = vmatpush.msra.mxu1 %v578_v47  ;;  %1491 = vmatpush.msra.mxu2 %v578_v47 }
  0xf7   : > { %1492 = vmatpush.msrb.mxu3 %v578_v47  ;;  %v2070_v26 = vpop.permute.xlu2 %1106 }
  0xf8   : > { %718 = vmatpush.msra.mxu1 %v577_v57  ;;  %1493 = vmatpush.msra.mxu2 %v577_v57 }
  0xf9   : > { %1494 = vmatpush.msrb.mxu3 %v577_v57 }
  0xfa   : > { %719 = vmatpush.msra.mxu1 %v576_v59  ;;  %1495 = vmatpush.msra.mxu2 %v576_v59 }
  0xfb   : > { %1496 = vmatpush.msrb.mxu3 %v576_v59  ;;  %720 = vmatmul.f32.vlgmr.msra.gmra.mxu1 %v592_v58  ;;  %v702_v27 = vpop.permute.xlu1 %701  ;;  %v2072_v28 = vpop.permute.xlu0 %1096 }
  0xfc   : > { %741 = vmatmul.f32.vlgmr.msra.gmra.mxu2 %v599_v60  ;;  %762 = vmatmul.f32.vlgmr.msrb.gmra.mxu3 %v606_v61 }
  0xff   : > { %v2074_v29 = vpop.permute.xlu2 %1121 }
 0x100   : > { %2482 = vst [vmem:[#allocation2_spill] sm:$0xff] %v2074_v29 }
 0x103   : > { %723 = vmatmul.f32.gmra.mxu1 %v593_v33  ;;  %v2076_v30 = vpop.permute.xlu1 %1101  ;;  %v2078_v31 = vpop.permute.xlu0 %1111 }
 0x104   : > { %744 = vmatmul.f32.gmra.mxu2 %v600_v63  ;;  %765 = vmatmul.f32.gmra.mxu3 %v607_v0 }
 0x107   : > { %v2080_v32 = vpop.permute.xlu2 %1136 }
 0x10b   : > { %726 = vmatmul.f32.gmra.mxu1 %v594_v1  ;;  %v2082_v34 = vpop.permute.xlu1 %1116  ;;  %v2084_v35 = vpop.permute.xlu0 %1126 }
 0x10c   : > { %747 = vmatmul.f32.gmra.mxu2 %v601_v2  ;;  %2483 = vst [vmem:[#allocation3_spill] sm:$0xff] %v2082_v34 }
 0x10f   : > { %v2086_v36 = vpop.permute.xlu2 %1151 }
 0x110   : > { %2484 = vst [vmem:[#allocation4_spill] sm:$0xff] %v2086_v36 }
 0x113   : > { %729 = vmatmul.f32.gmra.mxu1 %v595_v5  ;;  %v2088_v37 = vpop.permute.xlu1 %1131  ;;  %v2090_v38 = vpop.permute.xlu0 %1141 }
 0x114   : > { %750 = vmatmul.f32.gmra.mxu2 %v602_v6 }
 0x117   : > { %v2092_v39 = vpop.permute.xlu2 %1166 }
 0x11b   : > { %732 = vmatmul.f32.gmra.mxu1 %v596_v9  ;;  %v2094_v40 = vpop.permute.xlu1 %1146  ;;  %v2096_v42 = vpop.permute.xlu0 %1156 }
 0x11c   : > { %753 = vmatmul.f32.gmra.mxu2 %v603_v10  ;;  %2485 = vst [vmem:[#allocation5_spill] sm:$0xff] %v2096_v42 }
 0x11f   : > { %v2098_v43 = vpop.permute.xlu2 %1240 }
 0x123   : > { %735 = vmatmul.f32.gmra.mxu1 %v597_v14  ;;  %v2100_v45 = vpop.permute.xlu1 %1161  ;;  %v2102_v48 = vpop.permute.xlu0 %1234 }
 0x124   : > { %756 = vmatmul.f32.gmra.mxu2 %v604_v15  ;;  %vm1281_vm1 = vcmp.eq.s32.totalorder %v2102_v48, 1 }
 0x127   : > { %v2104_v49 = vpop.permute.xlu2 %1249 }
 0x128   : > { %2486 = vst [vmem:[#allocation6_spill] sm:$0xff] %v2104_v49 }
 0x12b   : > { %738 = vmatmul.f32.gmra.mxu1 %v598_v19  ;;  %v2109_v53 = vpop.permute.xlu1 %1237  ;;  %v2111_v56 = vpop.permute.xlu0 %1243 }
 0x12c   : > { %759 = vmatmul.f32.gmra.mxu2 %v605_v20  ;;  %vm1282_vm0 = vcmp.eq.s32.totalorder %v2109_v53, 1 }
 0x12f   : > { %v2117_v47 = vpop.permute.xlu2 %1258 }
 0x133   : > { %v2129_v5 = vpop.permute.xlu1 %1246  ;;  %v2131_v6 = vpop.permute.xlu0 %1252 }
 0x134   : > { %2487 = vst [vmem:[#allocation7_spill] sm:$0xff] %v2131_v6 }
 0x137   : > { %v2137_v14 = vpop.permute.xlu2 %1267 }
 0x138   : > { %2488 = vst [vmem:[#allocation8_spill] sm:$0xff] %v2137_v14 }
 0x178   : > { %v721_v51 = vpop.f32.mrf.mxu1 }
 0x179   : > { %v2106_v44 = vadd.f32 %v721_v51, %v627_v4 }
 0x17b   : > { %v1437_v52 = vmul.f32 -1.442695, %v2106_v44 }
 0x17d   : > { %1525 = vpow2.f32 %v1437_v52 }
 0x17f   : > { %v742_v54 = vpop.f32.mrf.mxu2  ;;  %v763_v55 = vpop.f32.mrf.mxu3 }
 0x180   : > { %v2113_v46 = vadd.f32 %v742_v54, %v662_v8  ;;  %v2115_v50 = vadd.f32 %v763_v55, %v697_v25  ;;  %v724_v41 = vpop.f32.mrf.mxu1 }
 0x181   : > { %v2120_v57 = vadd.f32 %v724_v41, %v2007_v62 }
 0x182   : > { %v1444_v58 = vmul.f32 -1.442695, %v2113_v46  ;;  %v1451_v59 = vmul.f32 -1.442695, %v2115_v50 }
 0x183   : > { %v1526_v60 = vpop.eup %1525  ;;  %v1438_v61 = vmul.f32 -1.442695, %v2120_v57 }
 0x184   : > { %v817_v33 = vadd.f32 1.0, %v1526_v60  ;;  %1527 = vpow2.f32 %v1444_v58 }
 0x185   : > { %1529 = vpow2.f32 %v1451_v59 }
 0x186   : > { %1531 = vrcp.f32 %v817_v33  ;;  %v842_v51 = vand.u32 2147483647, %v817_v33  ;;  %v844_v52 = vand.u32 2147483648, %v817_v33  ;;  %vm838_vm3 = vweird.f32 %v817_v33 }
 0x187   : > { %1533 = vpow2.f32 %v1438_v61  ;;  %v745_v63 = vpop.f32.mrf.mxu2  ;;  %v766_v0 = vpop.f32.mrf.mxu3 }
 0x188   : > { %v2125_v1 = vadd.f32 %v745_v63, %v667_v17  ;;  %v2127_v2 = vadd.f32 %v766_v0, %v702_v27  ;;  %v727_v62 = vpop.f32.mrf.mxu1  ;;  %vm2155_vm4 = vcmp.eq.f32.partialorder %v842_v51, 8.507059e+37  ;;  %v2172_v51 = vpop.permute.xlu0 %1261 }
 0x189   : > { %v2135_v9 = vadd.f32 %v727_v62, %v2032_v7 }
 0x18a   : > { %v1528_v4 = vpop.eup %1527  ;;  %v1445_v8 = vmul.f32 -1.442695, %v2125_v1  ;;  %v1452_v20 = vmul.f32 -1.442695, %v2127_v2 }
 0x18b   : > { %v1530_v10 = vpop.eup %1529  ;;  %v2139_v15 = vadd.f32 1.0, %v1528_v4  ;;  %v1439_v7 = vmul.f32 -1.442695, %v2135_v9 }
 0x18c   : > { %v1532_v17 = vpop.eup %1531  ;;  %v2141_v19 = vadd.f32 1.0, %v1530_v10  ;;  %1535 = vpow2.f32 %v1445_v8  ;;  %v845_v8 = vor.u32 1.1754944e-38, %v844_v52 }
 0x18d   : > { %v1534_v25 = vpop.eup %1533  ;;  %v834_v27 = vmul.f32 %v1532_v17, %v817_v33  ;;  %1537 = vrcp.f32 %v2139_v15  ;;  %vm839_vm2 = vweird.f32 %v1532_v17  ;;  %v947_v58 = vand.u32 2147483647, %v2139_v15  ;;  %v2170_v33 = vpop.permute.xlu1 %1255 }
 0x18e   : > { %1539 = vrcp.f32 %v2141_v19  ;;  %v2147_v55 = vadd.f32 1.0, %v1534_v25  ;;  %v949_v59 = vand.u32 2147483648, %v2139_v15  ;;  %v1052_v61 = vand.u32 2147483647, %v2141_v19  ;;  %vm840_vm6 = vmor %vm838_vm3, %vm839_vm2 }
 0x18f   : > { %v835_v54 = vsub.f32 1.0, %v834_v27  ;;  %v748_v41 = vpop.f32.mrf.mxu2  ;;  %1541 = vpow2.f32 %v1452_v20  ;;  %v1054_v63 = vand.u32 2147483648, %v2141_v19  ;;  %vm943_vm5 = vweird.f32 %v2139_v15 }
 0x190   : > { %1543 = vrcp.f32 %v2147_v55  ;;  %v730_v0 = vpop.f32.mrf.mxu1  ;;  %v2165_v27 = vadd.f32 %v748_v41, %v2062_v21  ;;  %vm2177_vm7 = vcmp.eq.f32.partialorder %v947_v58, 8.507059e+37  ;;  %vm1048_vm8 = vweird.f32 %v2141_v19  ;;  %v2182_v21 = vpop.permute.xlu2 %1276 }
 0x191   : > { %v836_v60 = vmul.f32 %v1532_v17, %v835_v54  ;;  %1545 = vpow2.f32 %v1439_v7  ;;  %vm2186_vm9 = vcmp.eq.f32.partialorder %v1052_v61, 8.507059e+37  ;;  %v1055_v6 = vor.u32 1.1754944e-38, %v1054_v63 }
 0x192   : > { %v1536_v62 = vpop.eup %1535  ;;  %vm853_vm10 = vweird.f32 %v2147_v55  ;;  %v857_v36 = vand.u32 2147483647, %v2147_v55  ;;  %vm1288_vm11 = vcmp.eq.s32.totalorder %v2170_v33, 1  ;;  %vm1295_vm12 = vcmp.eq.s32.totalorder %v2182_v21, 1 }
 0x193   : > { %v2159_v10 = vpop.eup %1537  ;;  %v837_v20 = vadd.f32 %v1532_v17, %v836_v60  ;;  %v2162_v25 = vadd.f32 1.0, %v1536_v62  ;;  %v950_v60 = vor.u32 1.1754944e-38, %v949_v59  ;;  %v2213_v14 = vadd.f32 %v730_v0, %v2040_v11 }
 0x194   : > { %v2167_v54 = vpop.eup %1539  ;;  %v939_v52 = vmul.f32 %v2159_v10, %v2139_v15  ;;  %vm944_vm13 = vweird.f32 %v2159_v10  ;;  %vm2223_vm15 = vcmp.eq.f32.partialorder %v857_v36, 8.507059e+37 }
 0x195   : > { %v841_v41 = vsel %vm840_vm6, %v1532_v17, %v837_v20  ;;  %v1044_v62 = vmul.f32 %v2167_v54, %v2141_v19  ;;  %1547 = vrcp.f32 %v2162_v25  ;;  %v1542_v58 = vpop.eup %1541  ;;  %v859_v17 = vand.u32 2147483648, %v2147_v55 }
 0x196   : > { %v846_v29 = vsel %vm2155_vm4, %v845_v8, %v841_v41  ;;  %v940_v59 = vsub.f32 1.0, %v939_v52  ;;  %v1544_v20 = vpop.eup %1543  ;;  %v2203_v4 = vadd.f32 1.0, %v1542_v58  ;;  %v1446_v8 = vmul.f32 -1.442695, %v2165_v27 }
 0x197   : > { %v1169_v61 = vsub.f32 %v846_v29, %v2066_v23  ;;  %v1045_v63 = vsub.f32 1.0, %v1044_v62  ;;  %v2206_v52 = vpop.f32.mrf.mxu2  ;;  %v1546_v41 = vpop.eup %1545  ;;  %v849_v34 = vmul.f32 %v1544_v20, %v2147_v55  ;;  %vm1049_vm14 = vweird.f32 %v2167_v54 }
 0x198   : > { %v941_v49 = vmul.f32 %v2159_v10, %v940_v59  ;;  %1549 = vrcp.f32 %v2203_v4  ;;  %v860_v11 = vor.u32 1.1754944e-38, %v859_v17  ;;  %vm1050_vm2 = vmor %vm1048_vm8, %vm1049_vm14  ;;  %vm854_vm3 = vweird.f32 %v1544_v20 }
 0x199   : > { %v1297_v23 = vsel %vm1281_vm1, %v1169_v61, %v2106_v44  ;;  %v1046_v29 = vmul.f32 %v2167_v54, %v1045_v63  ;;  %v850_v58 = vsub.f32 1.0, %v849_v34  ;;  %vm945_vm1 = vmor %vm943_vm5, %vm944_vm13  ;;  %v962_v44 = vand.u32 2147483647, %v2162_v25 }
 0x19a   : > { %1313 = vst [vmem:[%s2199_s13] sm:$0xff] %v1297_v23  ;;  %v942_v62 = vadd.f32 %v2159_v10, %v941_v49  ;;  %v2232_v61 = vadd.f32 1.0, %v1546_v41  ;;  %1551 = vpow2.f32 %v1446_v8  ;;  %v733_v49 = vpop.f32.mrf.mxu1  ;;  %vm958_vm4 = vweird.f32 %v2162_v25  ;;  %v2245_v41 = vpop.permute.xlu0 %1270  ;;  %vm855_vm6 = vmor %vm853_vm10, %vm854_vm3 }
 0x19b   : > { %v1548_v0 = vpop.eup %1547  ;;  %v1047_v48 = vadd.f32 %v2167_v54, %v1046_v29  ;;  %v851_v36 = vmul.f32 %v1544_v20, %v850_v58  ;;  %v964_v8 = vand.u32 2147483648, %v2162_v25  ;;  %vm1289_vm5 = vcmp.eq.s32.totalorder %v2117_v47, 1 }
 0x19c   : > { %v946_v34 = vsel %vm945_vm1, %v2159_v10, %v942_v62  ;;  %v954_v15 = vmul.f32 %v1548_v0, %v2162_v25  ;;  %vm2254_vm8 = vcmp.eq.f32.partialorder %v962_v44, 8.507059e+37  ;;  %1553 = vrcp.f32 %v2232_v61 }
 0x19d   : > { %v951_v17 = vsel %vm2177_vm7, %v950_v60, %v946_v34  ;;  %v1051_v63 = vsel %vm1050_vm2, %v2167_v54, %v1047_v48  ;;  %v852_v23 = vadd.f32 %v1544_v20, %v851_v36  ;;  %vm959_vm7 = vweird.f32 %v1548_v0 }
 0x19e   : > { %v1176_v10 = vsub.f32 %v951_v17, %v2084_v35  ;;  %v1056_v19 = vsel %vm2186_vm9, %v1055_v6, %v1051_v63  ;;  %v955_v29 = vsub.f32 1.0, %v954_v15  ;;  %v1550_v62 = vpop.eup %1549  ;;  %v965_v44 = vor.u32 1.1754944e-38, %v964_v8  ;;  %vm960_vm9 = vmor %vm958_vm4, %vm959_vm7 }
 0x19f   : > { %v1183_v7 = vsub.f32 %v1056_v19, %v2100_v45  ;;  %v754_v35 = vpop.f32.mrf.mxu2  ;;  %v856_v6 = vsel %vm855_vm6, %v1544_v20, %v852_v23  ;;  %v1059_v45 = vmul.f32 %v1550_v62, %v2203_v4  ;;  %v1067_v34 = vand.u32 2147483647, %v2203_v4 }
 0x1a0   : > { %v1304_v42 = vsel %vm1288_vm11, %v1176_v10, %v2113_v46  ;;  %v956_v60 = vmul.f32 %v1548_v0, %v955_v29  ;;  %v1552_v58 = vpop.eup %1551  ;;  %v861_v48 = vsel %vm2223_vm15, %v860_v11, %v856_v6  ;;  %v1069_v36 = vand.u32 2147483648, %v2203_v4 }
 0x1a1   : > { %1320 = vst [vmem:[%s2199_s13 + $0x38] sm:$0xff] %v1304_v42  ;;  %v1311_v55 = vsel %vm1295_vm12, %v1183_v7, %v2115_v50  ;;  %v1170_v46 = vsub.f32 %v861_v48, %v2072_v28  ;;  %v1060_v20 = vsub.f32 1.0, %v1059_v45  ;;  %vm1064_vm10 = vweird.f32 %v1550_v62 }
 0x1a2   : > { %1327 = vst [vmem:[%s2199_s13 + $0x70] sm:$0xff] %v1311_v55  ;;  %v957_v33 = vadd.f32 %v1548_v0, %v956_v60  ;;  %v2276_v50 = vadd.f32 1.0, %v1552_v58  ;;  %v1440_v21 = vmul.f32 -1.442695, %v2213_v14  ;;  %v2281_v59 = vadd.f32 %v2206_v52, %v2044_v13  ;;  %v1554_v25 = vpop.eup %1553  ;;  %v736_v13 = vpop.f32.mrf.mxu1 }
 0x1a3   : > { %v1298_v28 = vsel %vm1282_vm0, %v1170_v46, %v2120_v57  ;;  %v1061_v15 = vmul.f32 %v1550_v62, %v1060_v20  ;;  %v2287_v17 = vadd.f32 %v733_v49, %v2021_v3  ;;  %vm1063_vm11 = vweird.f32 %v2203_v4  ;;  %v1280_v10 = vpop.permute.xlu0 %1279 }
 0x1a4   : > { %v961_v11 = vsel %vm960_vm9, %v1548_v0, %v957_v33  ;;  %1314 = vst [vmem:[%s2199_s13 + $0x8] sm:$0xff] %v1298_v28  ;;  %vm2293_vm12 = vcmp.eq.f32.partialorder %v1067_v34, 8.507059e+37  ;;  %1555 = vrcp.f32 %v2276_v50  ;;  %v1070_v3 = vor.u32 1.1754944e-38, %v1069_v36  ;;  %vm1065_vm13 = vmor %vm1063_vm11, %vm1064_vm10 }
 0x1a5   : > { %v966_v63 = vsel %vm2254_vm8, %v965_v44, %v961_v11  ;;  %v1062_v57 = vadd.f32 %v1550_v62, %v1061_v15  ;;  %v864_v52 = vmul.f32 %v1554_v25, %v2232_v61  ;;  %v872_v0 = vand.u32 2147483647, %v2232_v61 }
 0x1a6   : > { %v1177_v53 = vsub.f32 %v966_v63, %v2088_v37  ;;  %v874_v4 = vand.u32 2147483648, %v2232_v61  ;;  %1557 = vpow2.f32 %v1440_v21  ;;  %v1447_v49 = vmul.f32 -1.442695, %v2281_v59 }
 0x1a7   : > { %v1066_v23 = vsel %vm1065_vm13, %v1550_v62, %v1062_v57  ;;  %v865_v37 = vsub.f32 1.0, %v864_v52  ;;  %v1441_v29 = vmul.f32 -1.442695, %v2287_v17  ;;  %v757_v7 = vpop.f32.mrf.mxu2  ;;  %vm869_vm14 = vweird.f32 %v1554_v25 }
 0x1a8   : > { %v1305_v19 = vsel %vm1289_vm5, %v1177_v53, %v2125_v1  ;;  %v1071_v54 = vsel %vm2293_vm12, %v1070_v3, %v1066_v23  ;;  %1559 = vpow2.f32 %v1447_v49  ;;  %v2312_v42 = vadd.f32 %v754_v35, %v2064_v22 }
 0x1a9   : > { %1321 = vst [vmem:[%s2199_s13 + $0x40] sm:$0xff] %v1305_v19  ;;  %v1184_v6 = vsub.f32 %v1071_v54, %v2092_v39  ;;  %v866_v60 = vmul.f32 %v1554_v25, %v865_v37  ;;  %1561 = vpow2.f32 %v1441_v29  ;;  %v2316_v47 = vadd.f32 %v736_v13, %v2042_v12 }
 0x1aa   : > { %v1556_v1 = vpop.eup %1555  ;;  %vm1296_vm15 = vcmp.eq.s32.totalorder %v1280_v10, 1  ;;  %v1448_v62 = vmul.f32 -1.442695, %v2312_v42  ;;  %v2320_v45 = vadd.f32 %v757_v7, %v2068_v24  ;;  %vm868_vm0 = vweird.f32 %v2232_v61  ;;  %v739_v20 = vpop.f32.mrf.mxu1 }
 0x1ab   : > { %v1312_v58 = vsel %vm1296_vm15, %v1184_v6, %v2127_v2  ;;  %v867_v55 = vadd.f32 %v1554_v25, %v866_v60  ;;  %v969_v22 = vmul.f32 %v1556_v1, %v2276_v50  ;;  %vm870_vm1 = vmor %vm868_vm0, %vm869_vm14  ;;  %vm873_vm2 = vcmp.eq.f32.partialorder %v872_v0, 8.507059e+37 }
 0x1ac   : > { %v1558_v39 = vpop.eup %1557  ;;  %1328 = vst [vmem:[%s2199_s13 + $0x78] sm:$0xff] %v1312_v58  ;;  %v875_v12 = vor.u32 1.1754944e-38, %v874_v4  ;;  %1563 = vpow2.f32 %v1448_v62  ;;  %v1442_v35 = vmul.f32 -1.442695, %v2316_v47  ;;  %v1449_v2 = vmul.f32 -1.442695, %v2320_v45 }
 0x1ad   : > { %v871_v48 = vsel %vm870_vm1, %v1554_v25, %v867_v55  ;;  %v970_v44 = vsub.f32 1.0, %v969_v22  ;;  %v2328_v24 = vadd.f32 1.0, %v1558_v39  ;;  %v977_v61 = vand.u32 2147483647, %v2276_v50 }
 0x1ae   : > { %v1560_v34 = vpop.eup %1559  ;;  %v876_v46 = vsel %vm873_vm2, %v875_v12, %v871_v48  ;;  %v979_v33 = vand.u32 2147483648, %v2276_v50  ;;  %1565 = vpow2.f32 %v1442_v35  ;;  %vm974_vm3 = vweird.f32 %v1556_v1 }
 0x1af   : > { %v1562_v36 = vpop.eup %1561  ;;  %v1171_v21 = vsub.f32 %v876_v46, %v2076_v30  ;;  %v971_v28 = vmul.f32 %v1556_v1, %v970_v44  ;;  %1567 = vrcp.f32 %v2328_v24  ;;  %vm1283_vm4 = vcmp.eq.s32.totalorder %v2098_v43, 1 }
 0x1b0   : > { %vm973_vm5 = vweird.f32 %v2276_v50  ;;  %v2337_v11 = vadd.f32 1.0, %v1560_v34  ;;  %v2339_v15 = vadd.f32 1.0, %v1562_v36  ;;  %1569 = vpow2.f32 %v1449_v2 }
 0x1b1   : > { %v1299_v25 = vsel %vm1283_vm4, %v1171_v21, %v2135_v9  ;;  %v972_v63 = vadd.f32 %v1556_v1, %v971_v28  ;;  %v2343_v8 = vadd.f32 %v739_v20, %v2052_v16  ;;  %vm975_vm6 = vmor %vm973_vm5, %vm974_vm3  ;;  %v980_v13 = vor.u32 1.1754944e-38, %v979_v33  ;;  %v760_v9 = vpop.f32.mrf.mxu2 }
 0x1b2   : > { %v1564_v30 = vpop.eup %1563  ;;  %1315 = vst [vmem:[%s2199_s13 + $0x10] sm:$0xff] %v1299_v25  ;;  %v887_v53 = vand.u32 2147483647, %v2328_v24  ;;  %v889_v43 = vand.u32 2147483648, %v2328_v24  ;;  %1571 = vrcp.f32 %v2337_v11  ;;  %vm978_vm7 = vcmp.eq.f32.partialorder %v977_v61, 8.507059e+37 }
 0x1b3   : > { %v976_v50 = vsel %vm975_vm6, %v1556_v1, %v972_v63  ;;  %1573 = vrcp.f32 %v2339_v15  ;;  %vm1290_vm8 = vcmp.eq.s32.totalorder %v2172_v51, 1  ;;  %vm883_vm9 = vweird.f32 %v2328_v24  ;;  %v1265_v1 = vpop.permute.xlu1 %1264 }
 0x1b4   : > { %v1566_v57 = vpop.eup %1565  ;;  %v981_v16 = vsel %vm978_vm7, %v980_v13, %v976_v50  ;;  %v2353_v0 = vadd.f32 1.0, %v1564_v30  ;;  %v1443_v4 = vmul.f32 -1.442695, %v2343_v8  ;;  %vm2357_vm10 = vcmp.eq.f32.partialorder %v887_v53, 8.507059e+37 }
 0x1b5   : > { %v1568_v3 = vpop.eup %1567  ;;  %v1178_v52 = vsub.f32 %v981_v16, %v2080_v32  ;;  %v890_v19 = vor.u32 1.1754944e-38, %v889_v43  ;;  %v2362_v51 = vadd.f32 %v760_v9, %v2054_v18  ;;  %v992_v32 = vand.u32 2147483647, %v2337_v11 }
 0x1b6   : > { %v879_v49 = vmul.f32 %v1568_v3, %v2328_v24  ;;  %v1570_v23 = vpop.eup %1569  ;;  %v994_v29 = vand.u32 2147483648, %v2337_v11  ;;  %1575 = vrcp.f32 %v2353_v0  ;;  %vm988_vm11 = vweird.f32 %v2337_v11 }
 0x1b7   : > { %v1306_v37 = vsel %vm1290_vm8, %v1178_v52, %v2165_v27  ;;  %v2370_v6 = vadd.f32 1.0, %v1566_v57  ;;  %v2372_v60 = vadd.f32 1.0, %v1570_v23  ;;  %vm1284_vm12 = vcmp.eq.s32.totalorder %v2111_v56, 1 }
 0x1b8   : > { %v1572_v7 = vpop.eup %1571  ;;  %1322 = vst [vmem:[%s2199_s13 + $0x48] sm:$0xff] %v1306_v37  ;;  %v880_v54 = vsub.f32 1.0, %v879_v49  ;;  %vm898_vm13 = vweird.f32 %v2339_v15  ;;  %v902_v62 = vand.u32 2147483647, %v2339_v15  ;;  %1577 = vpow2.f32 %v1443_v4 }
 0x1b9   : > { %v1574_v18 = vpop.eup %1573  ;;  %v984_v27 = vmul.f32 %v1572_v7, %v2337_v11  ;;  %vm884_vm14 = vweird.f32 %v1568_v3  ;;  %v904_v22 = vand.u32 2147483648, %v2339_v15  ;;  %vm2380_vm15 = vcmp.eq.f32.partialorder %v992_v32, 8.507059e+37 }
 0x1ba   : > { %v881_v58 = vmul.f32 %v1568_v3, %v880_v54  ;;  %v894_v55 = vmul.f32 %v1574_v18, %v2339_v15  ;;  %v995_v35 = vor.u32 1.1754944e-38, %v994_v29  ;;  %1579 = vrcp.f32 %v2370_v6  ;;  %vm885_vm2 = vmor %vm883_vm9, %vm884_vm14 }
 0x1bb   : > { %v985_v39 = vsub.f32 1.0, %v984_v27  ;;  %vm1291_vm0 = vcmp.eq.s32.totalorder %v1265_v1, 1  ;;  %v1007_v2 = vand.u32 2147483647, %v2353_v0  ;;  %1581 = vrcp.f32 %v2372_v60 }
 0x1bc   : > { %v882_v48 = vadd.f32 %v1568_v3, %v881_v58  ;;  %v895_v44 = vsub.f32 1.0, %v894_v55  ;;  %v1576_v34 = vpop.eup %1575  ;;  %vm1285_vm1 = vcmp.eq.s32.totalorder %v2129_v5, 1  ;;  %vm989_vm3 = vweird.f32 %v1572_v7  ;;  %v2509_v5 = vld [vmem:[#allocation8_spill] sm:$0xff] }
 0x1bd   : > { %v986_v46 = vmul.f32 %v1572_v7, %v985_v39  ;;  %vm2390_vm4 = vcmp.eq.f32.partialorder %v902_v62, 8.507059e+37  ;;  %v1009_v33 = vand.u32 2147483648, %v2353_v0  ;;  %vm899_vm5 = vweird.f32 %v1574_v18  ;;  %vm990_vm7 = vmor %vm988_vm11, %vm989_vm3 }
 0x1be   : > { %v886_v20 = vsel %vm885_vm2, %v1568_v3, %v882_v48  ;;  %v896_v36 = vmul.f32 %v1574_v18, %v895_v44  ;;  %v999_v21 = vmul.f32 %v1576_v34, %v2353_v0  ;;  %v1578_v28 = vpop.eup %1577  ;;  %v905_v24 = vor.u32 1.1754944e-38, %v904_v22  ;;  %vm900_vm9 = vmor %vm898_vm13, %vm899_vm5 }
 0x1bf   : > { %v891_v25 = vsel %vm2357_vm10, %v890_v19, %v886_v20  ;;  %v987_v63 = vadd.f32 %v1572_v7, %v986_v46  ;;  %vm1003_vm6 = vweird.f32 %v2353_v0  ;;  %vm2402_vm8 = vcmp.eq.f32.partialorder %v1007_v2, 8.507059e+37  ;;  %v2511_v46 = vld [vmem:[#allocation6_spill] sm:$0xff] }
 0x1c0   : > { %v1172_v30 = vsub.f32 %v891_v25, %v2070_v26  ;;  %v897_v13 = vadd.f32 %v1574_v18, %v896_v36  ;;  %v1000_v53 = vsub.f32 1.0, %v999_v21  ;;  %v1580_v50 = vpop.eup %1579  ;;  %vm1004_vm10 = vweird.f32 %v1576_v34 }
 0x1c1   : > { %v991_v9 = vsel %vm990_vm7, %v1572_v7, %v987_v63  ;;  %v1010_v57 = vor.u32 1.1754944e-38, %v1009_v33  ;;  %v2408_v16 = vadd.f32 1.0, %v1578_v28  ;;  %v1582_v26 = vpop.eup %1581  ;;  %v909_v10 = vmul.f32 %v1580_v50, %v2370_v6  ;;  %vm1005_vm11 = vmor %vm1003_vm6, %vm1004_vm10 }
 0x1c2   : > { %v1300_v11 = vsel %vm1284_vm12, %v1172_v30, %v2213_v14  ;;  %v996_v3 = vsel %vm2380_vm15, %v995_v35, %v991_v9  ;;  %v901_v52 = vsel %vm900_vm9, %v1574_v18, %v897_v13  ;;  %v1001_v4 = vmul.f32 %v1576_v34, %v1000_v53  ;;  %v2513_v13 = vld [vmem:[#allocation2_spill] sm:$0xff] }
 0x1c3   : > { %1316 = vst [vmem:[%s2199_s13 + $0x18] sm:$0xff] %v1300_v11  ;;  %v1179_v49 = vsub.f32 %v996_v3, %v2090_v38  ;;  %v906_v15 = vsel %vm2390_vm4, %v905_v24, %v901_v52  ;;  %v917_v19 = vand.u32 2147483647, %v2370_v6  ;;  %v1014_v23 = vmul.f32 %v1582_v26, %v2372_v60 }
 0x1c4   : > { %v1173_v56 = vsub.f32 %v906_v15, %v2078_v31  ;;  %v1002_v14 = vadd.f32 %v1576_v34, %v1001_v4  ;;  %v1450_v37 = vmul.f32 -1.442695, %v2362_v51  ;;  %v910_v38 = vsub.f32 1.0, %v909_v10  ;;  %v1274_v4 = vpop.permute.xlu1 %1273  ;;  %v2515_v10 = vld [vmem:[#allocation5_spill] sm:$0xff] }
 0x1c5   : > { %v1307_v32 = vsel %vm1291_vm0, %v1179_v49, %v2281_v59  ;;  %v919_v29 = vand.u32 2147483648, %v2370_v6  ;;  %1583 = vrcp.f32 %v2408_v16  ;;  %v1015_v54 = vsub.f32 1.0, %v1014_v23 }
 0x1c6   : > { %1323 = vst [vmem:[%s2199_s13 + $0x50] sm:$0xff] %v1307_v32  ;;  %v1301_v31 = vsel %vm1285_vm1, %v1173_v56, %v2287_v17  ;;  %v1006_v7 = vsel %vm1005_vm11, %v1576_v34, %v1002_v14  ;;  %v1022_v18 = vand.u32 2147483647, %v2372_v60  ;;  %v911_v0 = vmul.f32 %v1580_v50, %v910_v38 }
 0x1c7   : > { %1317 = vst [vmem:[%s2199_s13 + $0x20] sm:$0xff] %v1301_v31  ;;  %v1011_v59 = vsel %vm2402_vm8, %v1010_v57, %v1006_v7  ;;  %vm914_vm12 = vweird.f32 %v1580_v50  ;;  %v1024_v1 = vand.u32 2147483648, %v2372_v60  ;;  %v1016_v62 = vmul.f32 %v1582_v26, %v1015_v54 }
 0x1c8   : > { %v1180_v27 = vsub.f32 %v1011_v59, %v2094_v40  ;;  %vm1019_vm13 = vweird.f32 %v1582_v26  ;;  %1585 = vpow2.f32 %v1450_v37  ;;  %vm1292_vm14 = vcmp.eq.s32.totalorder %v2509_v5, 1 }
 0x1c9   : > { %v912_v17 = vadd.f32 %v1580_v50, %v911_v0  ;;  %vm913_vm15 = vweird.f32 %v2370_v6  ;;  %v920_v55 = vor.u32 1.1754944e-38, %v919_v29  ;;  %v1017_v22 = vadd.f32 %v1582_v26, %v1016_v62  ;;  %v2510_v6 = vld [vmem:[#allocation3_spill] sm:$0xff] }
 0x1ca   : > { %v1308_v58 = vsel %vm1292_vm14, %v1180_v27, %v2312_v42  ;;  %vm915_vm0 = vmor %vm913_vm15, %vm914_vm12  ;;  %vm1018_vm1 = vweird.f32 %v2372_v60  ;;  %vm918_vm2 = vcmp.eq.f32.partialorder %v917_v19, 8.507059e+37  ;;  %v1025_v40 = vor.u32 1.1754944e-38, %v1024_v1  ;;  %v2512_v60 = vld [vmem:[#allocation4_spill] sm:$0xff] }
 0x1cb   : > { %v1584_v39 = vpop.eup %1583  ;;  %1324 = vst [vmem:[%s2199_s13 + $0x58] sm:$0xff] %v1308_v58  ;;  %v916_v12 = vsel %vm915_vm0, %v1580_v50, %v912_v17  ;;  %vm1020_vm3 = vmor %vm1018_vm1, %vm1019_vm13  ;;  %vm1023_vm4 = vcmp.eq.f32.partialorder %v1022_v18, 8.507059e+37  ;;  %vm1286_vm5 = vcmp.eq.s32.totalorder %v2511_v46, 1  ;;  %vm1293_vm6 = vcmp.eq.s32.totalorder %v2245_v41, 1  ;;  %v2514_v50 = vld [vmem:[#allocation7_spill] sm:$0xff] }
 0x1cc   : > { %v921_v35 = vsel %vm918_vm2, %v920_v55, %v916_v12  ;;  %v1021_v48 = vsel %vm1020_vm3, %v1582_v26, %v1017_v22  ;;  %v924_v44 = vmul.f32 %v1584_v39, %v2408_v16  ;;  %v934_v36 = vand.u32 2147483648, %v2408_v16 }
 0x1cd   : > { %v1174_v42 = vsub.f32 %v921_v35, %v2510_v6  ;;  %v1026_v2 = vsel %vm1023_vm4, %v1025_v40, %v1021_v48  ;;  %vm929_vm7 = vweird.f32 %v1584_v39  ;;  %v932_v63 = vand.u32 2147483647, %v2408_v16 }
 0x1ce   : > { %v1586_v34 = vpop.eup %1585  ;;  %v1181_v61 = vsub.f32 %v1026_v2, %v2512_v60  ;;  %v925_v33 = vsub.f32 1.0, %v924_v44  ;;  %vm928_vm8 = vweird.f32 %v2408_v16  ;;  %v935_v41 = vor.u32 1.1754944e-38, %v934_v36 }
 0x1cf   : > { %v1302_v20 = vsel %vm1286_vm5, %v1174_v42, %v2316_v47  ;;  %v830_v21 = vadd.f32 1.0, %v1586_v34  ;;  %vm930_vm9 = vmor %vm928_vm8, %vm929_vm7  ;;  %vm933_vm10 = vcmp.eq.f32.partialorder %v932_v63, 8.507059e+37  ;;  %vm1287_vm11 = vcmp.eq.s32.totalorder %v2514_v50, 1 }
 0x1d0   : > { %1318 = vst [vmem:[%s2199_s13 + $0x28] sm:$0xff] %v1302_v20  ;;  %v1309_v28 = vsel %vm1293_vm6, %v1181_v61, %v2320_v45  ;;  %v926_v25 = vmul.f32 %v1584_v39, %v925_v33  ;;  %vm1294_vm0 = vcmp.eq.s32.totalorder %v1274_v4, 1 }
 0x1d1   : > { %1325 = vst [vmem:[%s2199_s13 + $0x60] sm:$0xff] %v1309_v28  ;;  %1587 = vrcp.f32 %v830_v21  ;;  %v1039_v26 = vand.u32 2147483648, %v830_v21  ;;  %v1037_v16 = vand.u32 2147483647, %v830_v21  ;;  %vm1033_vm13 = vweird.f32 %v830_v21 }
 0x1d2   : > { %v927_v24 = vadd.f32 %v1584_v39, %v926_v25 }
 0x1d3   : > { %v1040_v52 = vor.u32 1.1754944e-38, %v1039_v26  ;;  %vm1038_vm15 = vcmp.eq.f32.partialorder %v1037_v16, 8.507059e+37 }
 0x1d4   : > { %v931_v30 = vsel %vm930_vm9, %v1584_v39, %v927_v24 }
 0x1d5   : > { %v936_v47 = vsel %vm933_vm10, %v935_v41, %v931_v30 }
 0x1d6   : > { %v1175_v53 = vsub.f32 %v936_v47, %v2513_v13 }
 0x1d7   : > { %v1588_v43 = vpop.eup %1587 }
 0x1d8   : > { %v1303_v45 = vsel %vm1287_vm11, %v1175_v53, %v2343_v8  ;;  %v1029_v9 = vmul.f32 %v1588_v43, %v830_v21  ;;  %vm1034_vm12 = vweird.f32 %v1588_v43 }
 0x1d9   : > { %1319 = vst [vmem:[%s2199_s13 + $0x30] sm:$0xff] %v1303_v45  ;;  %vm1035_vm14 = vmor %vm1033_vm13, %vm1034_vm12 }
 0x1da   : > { %v1030_v57 = vsub.f32 1.0, %v1029_v9 }
 0x1dc   : > { %v1031_v11 = vmul.f32 %v1588_v43, %v1030_v57 }
 0x1de   : > { %v1032_v3 = vadd.f32 %v1588_v43, %v1031_v11 }
 0x1e0   : > { %v1036_v49 = vsel %vm1035_vm14, %v1588_v43, %v1032_v3 }
 0x1e1   : > { %v1041_v15 = vsel %vm1038_vm15, %v1040_v52, %v1036_v49 }
 0x1e2   : > { %v1182_v19 = vsub.f32 %v1041_v15, %v2515_v10 }
 0x1e4   : > { %v1310_v8 = vsel %vm1294_vm0, %v1182_v19, %v2362_v51 }
 0x1e5   : > { %1326 = vst [vmem:[%s2199_s13 + $0x68] sm:$0xff] %v1310_v8 }
 0x1e6 PF: > { %s17_s26 = sadd.s32 1, %s1611_s26   ;;  %s2516_s24 = smov %s1607_s25 }
 0x1e7   : > { %p14_p5 = scmp.ge.s32.totalorder %s17_s26, 4   ;;  %s2517_s25 = smov %s2519_s27 }
 0x1e9   :  { %16 = sbr.rel (!%p14_p5) target bundleno = 2 (0x2), region = 78 }

</bundles_post_ra>
